<compile_context>
chip_gen: v6e
topology: v6e:2x2x1
jax: 0.10.0
libtpu: 0.0.40
codegen_flags: <defaults>
</compile_context>

<pallas_src>
import numpy as np
import jax
import jax.numpy as jnp
from jax.experimental import pallas as pl
from jax.experimental.pallas import tpu as pltpu


def _round_up(x, m):
    return ((x + m - 1) // m) * m


# ----------------------------- Pallas kernel -------------------------------

def _pcoc_kernel(x_ref, wenc_ref, benc_ref, wsq_ref, wlin_ref, bias_ref,
                 out_ref, acc_ref):
    # x_ref:    (TB, TF)        flattened NCHW input tile (f32 / bf16)
    # wenc_ref: (TF, Dp)        encoder weight tile (same dtype as x)
    # benc_ref: (1, Dp)   f32   encoder bias (zero in D padding)
    # wsq_ref:  (Dp, Yp)  f32   -0.5 * W^T      (zero padded rows / lanes)
    # wlin_ref: (Dp, Yp)  f32   (W * mu)^T      (zero padded rows / lanes)
    # bias_ref: (1, Yp)   f32   folded per-class constants (zero in padding)
    # out_ref:  (TB, Yp)        logp (padded class lanes hold garbage-free 0+bias=0)
    # acc_ref:  (TB, Dp)  f32   encoder-matmul accumulator (VMEM scratch)
    kf = pl.program_id(1)

    @pl.when(kf == 0)
    def _():
        acc_ref[...] = jnp.zeros_like(acc_ref)

    acc_ref[...] += jnp.dot(x_ref[...], wenc_ref[...],
                            preferred_element_type=jnp.float32)

    @pl.when(kf == pl.num_programs(1) - 1)
    def _():
        phi = jnp.maximum(acc_ref[...] + benc_ref[...], 0.0)     # (TB, Dp) f32
        logp = (jnp.dot(phi * phi, wsq_ref[...],
                        preferred_element_type=jnp.float32)
                + jnp.dot(phi, wlin_ref[...],
                          preferred_element_type=jnp.float32)
                + bias_ref[...])
        out_ref[...] = logp.astype(out_ref.dtype)


def _make_spec(shape, index_map, single_buffer=False):
    """BlockSpec helper; single-buffers constant-index (resident) operands."""
    if single_buffer:
        try:
            return pl.BlockSpec(shape, index_map, pipeline_mode=pl.Buffered(1))
        except Exception:
            pass  # older jax without pipeline_mode: fall back to default
    return pl.BlockSpec(shape, index_map)


# ------------------------------- wrapper ------------------------------------

def pcoc_forward(x, posterior_params, logSigEps, enc_w, enc_b,
                 phi_dim, cov_dim, *, compute_dtype=jnp.bfloat16,
                 out_dtype=jnp.float32, tb_max=512):
    """Equivalent of PCOC.forward(x, posterior_params)."""
    Q, Linv, dir_weights = posterior_params          # (Y,cd,k), (Y,cd), (Y,)
    y_dim, cd, k = Q.shape
    assert cd == cov_dim and cd * k == phi_dim
    D = phi_dim

    B = x.shape[0]
    x_flat = x.reshape(B, -1)                        # glue: NCHW -> (B, F)
    F = x_flat.shape[1]

    # ---- tile geometry ----
    # >=4 batch tiles (when B allows) so both TensorCores share the parallel
    # axis; rows rounded to 16 sublanes; capped by tb_max for VMEM.
    TB = min(int(tb_max), max(16, _round_up(int(pl.cdiv(B, 4)), 16)))
    n_b = int(pl.cdiv(B, TB))
    B_pad = n_b * TB
    Y_pad = _round_up(y_dim, 128)                    # lane-dense class dim
    Dp = _round_up(D, 128)                           # lane-dense phi dim
    F_pad = _round_up(F, 128)

    xbytes = jnp.dtype(compute_dtype).itemsize
    obytes = jnp.dtype(out_dtype).itemsize

    # ---- VMEM budget (conservative: ~75% of physical; v7x has only 64 MiB) ----
    try:
        vmem_cap = int(pltpu.get_tpu_info().vmem_capacity_bytes)
    except Exception:
        vmem_cap = 64 * 2**20
    budget = int(min(max(int(0.75 * vmem_cap), 32 * 2**20), 112 * 2**20))

    fixed_bytes = (2 * TB * Y_pad * obytes           # out tile (double-buffered)
                   + TB * Dp * 4                     # accumulator scratch
                   + 2 * Dp * Y_pad * 4              # wsq + wlin (single-buffered)
                   + 2 * TB * Dp * 4                 # phi / phi^2 temporaries
                   + (Dp + Y_pad) * 4                # biases
                   + (2 << 20))                      # compiler headroom

    resident_bytes = F_pad * Dp * xbytes + 2 * TB * F_pad * xbytes
    if fixed_bytes + resident_bytes <= budget:
        TF = F_pad                                   # encoder weight resident
    else:
        # stream encoder weight in (TF, Dp) tiles; x & wenc double-buffered
        per_tf = 2 * TB * xbytes + 2 * Dp * xbytes
        tf = (budget - fixed_bytes) // max(per_tf, 1)
        TF = int(max(128, min(F_pad, (tf // 128) * 128)))
    n_f = int(pl.cdiv(F_pad, TF))
    F_pad = n_f * TF
    weights_resident = (n_f == 1)

    # ---- input padding (zeros: numerically exact) ----
    x_p = x_flat.astype(compute_dtype)
    x_p = jnp.pad(x_p, ((0, B_pad - B), (0, F_pad - F)))

    # ---- parameter prep (glue, plain JAX) ----
    SigEps = jnp.exp(logSigEps)                      # (Y, 1) broadcasts over cd
    mu = Q / Linv[..., None]                         # (Y, cd, k)
    pred_cov = 1.0 / Linv + SigEps                   # (Y, cd)
    inv_pc = 1.0 / pred_cov                          # (Y, cd)

    W_flat = jnp.repeat(inv_pc, k, axis=-1)          # (Y, D)
    M_flat = mu.reshape(y_dim, D)                    # (Y, D)

    normal_nll_const = D * np.log(2.0 * np.pi)
    nll_logdet = (D / cov_dim) * jnp.log(pred_cov).sum(-1)                 # (Y,)
    mu_term = (W_flat * M_flat * M_flat).sum(-1)                           # (Y,)
    log_dir = jnp.log(dir_weights / dir_weights.sum(-1, keepdims=True))    # (Y,)
    bias = (-0.5 * (mu_term + nll_logdet + normal_nll_const) + log_dir)    # (Y,)

    # logp = phi^2 @ Wsq + phi @ Wlin + bias   (padded rows/lanes are zero)
    wsq = jnp.pad((-0.5 * W_flat.T).astype(jnp.float32),
                  ((0, Dp - D), (0, Y_pad - y_dim)))                       # (Dp, Yp)
    wlin = jnp.pad((W_flat * M_flat).T.astype(jnp.float32),
                   ((0, Dp - D), (0, Y_pad - y_dim)))                      # (Dp, Yp)
    bias2d = jnp.pad(bias.astype(jnp.float32),
                     (0, Y_pad - y_dim)).reshape(1, Y_pad)
    enc_b2d = jnp.pad(enc_b.astype(jnp.float32), (0, Dp - D)).reshape(1, Dp)
    # TODO(synk): fp8 cast of enc_w for v7x where accuracy allows.
    enc_w_p = jnp.pad(enc_w.astype(compute_dtype),
                      ((0, F_pad - F), (0, Dp - D)))                       # (Fp, Dp)

    # ---- cost hint ----
    cost = pl.CostEstimate(
        flops=2 * B_pad * F_pad * Dp + 4 * B_pad * Dp * Y_pad + 3 * B_pad * Dp,
        transcendentals=0,
        bytes_accessed=(B_pad * F_pad * xbytes
                        + (1 if weights_resident else n_b) * F_pad * Dp * xbytes
                        + 2 * Dp * Y_pad * 4 + (Dp + Y_pad) * 4
                        + B_pad * Y_pad * obytes))

    grid_spec = pltpu.PrefetchScalarGridSpec(
        num_scalar_prefetch=0,
        grid=(n_b, n_f),
        in_specs=[
            # x: pipelined (batch, F) tile
            pl.BlockSpec((TB, TF), lambda i, kf: (i, kf)),
            # encoder weight: resident when n_f == 1, streamed otherwise
            _make_spec((TF, Dp), lambda i, kf: (kf, 0),
                       single_buffer=weights_resident),
            # constant-index parameters: single-buffered, VMEM-resident
            _make_spec((1, Dp), lambda i, kf: (0, 0), single_buffer=True),
            _make_spec((Dp, Y_pad), lambda i, kf: (0, 0), single_buffer=True),
            _make_spec((Dp, Y_pad), lambda i, kf: (0, 0), single_buffer=True),
            _make_spec((1, Y_pad), lambda i, kf: (0, 0), single_buffer=True),
        ],
        out_specs=pl.BlockSpec((TB, Y_pad), lambda i, kf: (i, 0)),
        scratch_shapes=[pltpu.VMEM((TB, Dp), jnp.float32)],
    )

    logp_pad = pl.pallas_call(
        _pcoc_kernel,
        out_shape=jax.ShapeDtypeStruct((B_pad, Y_pad), out_dtype),
        grid_spec=grid_spec,
        compiler_params=pltpu.CompilerParams(
            dimension_semantics=("parallel", "arbitrary"),
            vmem_limit_bytes=budget),
        cost_estimate=cost,
    )(x_p, enc_w_p, enc_b2d, wsq, wlin, bias2d)

    return logp_pad[:B, :y_dim].astype(jnp.float32)


# ----------------------------- reference (pure JAX) -------------------------

def pcoc_forward_ref(x, posterior_params, logSigEps, enc_w, enc_b,
                     phi_dim, cov_dim, compute_dtype=jnp.float32):
    Q, Linv, dir_weights = posterior_params
    y_dim, cd, k = Q.shape
    B = x.shape[0]
    x_flat = x.reshape(B, -1)
    h = jnp.dot(x_flat.astype(compute_dtype), enc_w.astype(compute_dtype),
                preferred_element_type=jnp.float32)
    phi = jnp.maximum(h + enc_b, 0.0)                         # (B, D)
    SigEps = jnp.exp(logSigEps)
    mu = Q / Linv[..., None]
    pred_cov = 1.0 / Linv + SigEps
    phi_r = phi.reshape(B, cd, k)
    err = phi_r[:, None, :, :] - mu[None]                     # (B, Y, cd, k)
    quad = (err ** 2 / pred_cov[None, :, :, None]).sum(-1).sum(-1)
    logdet = (phi_dim / cov_dim) * jnp.log(pred_cov).sum(-1)
    logp = -0.5 * (quad + logdet + phi_dim * np.log(2.0 * np.pi))
    logp = logp + jnp.log(dir_weights / dir_weights.sum(-1, keepdims=True))
    return logp


# ----------------------------------- main -----------------------------------

if __name__ == "__main__":
    # config (synthetic, deterministic)
    B, C, H, Wd = 2, 4, 16, 16
    phi_dim = 32
    y_dim = 8
    cov_dim = 4                      # must evenly divide phi_dim
    k = phi_dim // cov_dim
    sigma_eps_val = 0.1
    Linv_init = 1.0
    dirichlet_scale = 1.0

    key = jax.random.PRNGKey(0)
    kx, kq, kl, kw, kb = jax.random.split(key, 5)

    # inputs
    x = jax.random.normal(kx, (B, C, H, Wd), dtype=jnp.float32)

    # PCOC parameters (deterministic init, mirrors __init__ shapes)
    logSigEps = jnp.log(jnp.zeros((y_dim, 1), jnp.float32) + sigma_eps_val)
    Q0 = jax.random.normal(kq, (y_dim, cov_dim, k), dtype=jnp.float32)
    logLinv = jax.random.normal(kl, (y_dim, cov_dim), dtype=jnp.float32) + Linv_init
    log_dirichlet_priors = dirichlet_scale * jnp.ones((y_dim,), jnp.float32)

    # prior_params()
    Linv0 = jnp.exp(logLinv)
    dir_weights0 = jnp.exp(log_dirichlet_priors)
    posterior_params = (Q0, Linv0, dir_weights0)

    # TODO(synk): get_encoder(config) is external to the module; stand-in is a
    # deterministic flatten -> linear -> ReLU encoder with phi_dim outputs.
    F = C * H * Wd
    enc_w = jax.random.normal(kw, (F, phi_dim), dtype=jnp.float32) * 0.05
    enc_b = jax.random.normal(kb, (phi_dim,), dtype=jnp.float32) * 0.1

    # --- f32 path (strict correctness check) ---
    logp = pcoc_forward(x, posterior_params, logSigEps, enc_w, enc_b,
                        phi_dim, cov_dim, compute_dtype=jnp.float32)
    logp = jax.block_until_ready(logp)
    logp_ref = pcoc_forward_ref(x, posterior_params, logSigEps, enc_w, enc_b,
                                phi_dim, cov_dim, compute_dtype=jnp.float32)
    np.testing.assert_allclose(np.asarray(logp), np.asarray(logp_ref),
                               rtol=1e-4, atol=1e-3)

    # --- bf16 encoder-matmul fast path (default; class matmul stays f32) ---
    logp_bf16 = pcoc_forward(x, posterior_params, logSigEps, enc_w, enc_b,
                             phi_dim, cov_dim, compute_dtype=jnp.bfloat16)
    logp_bf16 = jax.block_until_ready(logp_bf16)
    logp_ref_bf16 = pcoc_forward_ref(x, posterior_params, logSigEps, enc_w,
                                     enc_b, phi_dim, cov_dim,
                                     compute_dtype=jnp.bfloat16)
    np.testing.assert_allclose(np.asarray(logp_bf16),
                               np.asarray(logp_ref_bf16),
                               rtol=2e-2, atol=2e-2)

    print("KERNEL_OK")
</pallas_src>

<mosaic_0001>
module attributes {stable_mosaic.version = 11 : i64} {
  func.func @_pcoc_kernel(%arg0: i32, %arg1: i32, %arg2: memref<16x1024xf32, #tpu.memory_space<vmem>>, %arg3: memref<1024x128xf32, #tpu.memory_space<vmem>>, %arg4: memref<1x128xf32, #tpu.memory_space<vmem>>, %arg5: memref<128x128xf32, #tpu.memory_space<vmem>>, %arg6: memref<128x128xf32, #tpu.memory_space<vmem>>, %arg7: memref<1x128xf32, #tpu.memory_space<vmem>>, %arg8: memref<16x128xf32, #tpu.memory_space<vmem>>, %arg9: memref<16x128xf32, #tpu.memory_space<vmem>>) attributes {dimension_semantics = [#tpu.dimension_semantics<parallel>, #tpu.dimension_semantics<arbitrary>], iteration_bounds = array<i64: 1, 1>, scalar_prefetch = 0 : i64, scratch_operands = 1 : i64, tpu.core_type = #tpu.core_type<tc>, window_params = [{transform_indices = @transform_0, window_bounds = array<i64: 16, 1024>}, {pipeline_mode = #tpu.pipeline_mode<synchronous>, transform_indices = @transform_1, window_bounds = array<i64: 1024, 128>}, {pipeline_mode = #tpu.pipeline_mode<synchronous>, transform_indices = @transform_2, window_bounds = array<i64: 1, 128>}, {pipeline_mode = #tpu.pipeline_mode<synchronous>, transform_indices = @transform_3, window_bounds = array<i64: 128, 128>}, {pipeline_mode = #tpu.pipeline_mode<synchronous>, transform_indices = @transform_4, window_bounds = array<i64: 128, 128>}, {pipeline_mode = #tpu.pipeline_mode<synchronous>, transform_indices = @transform_5, window_bounds = array<i64: 1, 128>}, {transform_indices = @transform_6, window_bounds = array<i64: 16, 128>}]} {
    %c0_i32 = arith.constant 0 : i32
    %0 = arith.cmpi eq, %arg1, %c0_i32 : i32
    %1 = arith.extui %0 : i1 to i32
    %c0_i32_0 = arith.constant 0 : i32
    %2 = arith.cmpi ne, %1, %c0_i32_0 : i32
    scf.if %2 {
      %cst_10 = arith.constant 0.000000e+00 : f32
      %12 = vector.broadcast %cst_10 : f32 to vector<16x128xf32>
      %c0_11 = arith.constant 0 : index
      %c0_12 = arith.constant 0 : index
      %13 = vector.load %arg9[%c0_11, %c0_12] : memref<16x128xf32, #tpu.memory_space<vmem>>, vector<16x128xf32>
      tpu.vector_store %arg9[%c0_11, %c0_12], %12 {strides = array<i32>} : memref<16x128xf32, #tpu.memory_space<vmem>>, vector<16x128xf32>,
    } else {
    }
    %c0 = arith.constant 0 : index
    %c0_1 = arith.constant 0 : index
    %3 = vector.load %arg9[%c0, %c0_1] : memref<16x128xf32, #tpu.memory_space<vmem>>, vector<16x128xf32>
    %c0_2 = arith.constant 0 : index
    %c0_3 = arith.constant 0 : index
    %4 = vector.load %arg2[%c0_2, %c0_3] : memref<16x1024xf32, #tpu.memory_space<vmem>>, vector<16x1024xf32>
    %c0_4 = arith.constant 0 : index
    %c0_5 = arith.constant 0 : index
    %5 = vector.load %arg3[%c0_4, %c0_5] : memref<1024x128xf32, #tpu.memory_space<vmem>>, vector<1024x128xf32>
    %cst = arith.constant dense<0.000000e+00> : vector<16x128xf32>
    %6 = tpu.matmul %4, %5, %cst {dimension_numbers = #tpu.dot_dimension_numbers<[1], [0], [0], [1], [0, 0, 1, 1], [], []>} : vector<16x1024xf32>, vector<1024x128xf32>, vector<16x128xf32> -> vector<16x128xf32>
    %7 = arith.addf %3, %6 : vector<16x128xf32>
    %c0_6 = arith.constant 0 : index
    %c0_7 = arith.constant 0 : index
    %8 = vector.load %arg9[%c0_6, %c0_7] : memref<16x128xf32, #tpu.memory_space<vmem>>, vector<16x128xf32>
    tpu.vector_store %arg9[%c0_6, %c0_7], %7 {strides = array<i32>} : memref<16x128xf32, #tpu.memory_space<vmem>>, vector<16x128xf32>,
    %c0_i32_8 = arith.constant 0 : i32
    %9 = arith.cmpi eq, %arg1, %c0_i32_8 : i32
    %10 = arith.extui %9 : i1 to i32
    %c0_i32_9 = arith.constant 0 : i32
    %11 = arith.cmpi ne, %10, %c0_i32_9 : i32
    scf.if %11 {
      %c0_10 = arith.constant 0 : index
      %c0_11 = arith.constant 0 : index
      %12 = vector.load %arg9[%c0_10, %c0_11] : memref<16x128xf32, #tpu.memory_space<vmem>>, vector<16x128xf32>
      %c0_12 = arith.constant 0 : index
      %c0_13 = arith.constant 0 : index
      %13 = vector.load %arg4[%c0_12, %c0_13] : memref<1x128xf32, #tpu.memory_space<vmem>>, vector<1x128xf32>
      %14 = vector.broadcast %13 : vector<1x128xf32> to vector<16x128xf32>
      %15 = arith.addf %12, %14 : vector<16x128xf32>
      %cst_14 = arith.constant 0.000000e+00 : f32
      %16 = vector.broadcast %cst_14 : f32 to vector<16x128xf32>
      %17 = arith.maximumf %15, %16 : vector<16x128xf32>
      %18 = arith.mulf %17, %17 : vector<16x128xf32>
      %c0_15 = arith.constant 0 : index
      %c0_16 = arith.constant 0 : index
      %19 = vector.load %arg5[%c0_15, %c0_16] : memref<128x128xf32, #tpu.memory_space<vmem>>, vector<128x128xf32>
      %cst_17 = arith.constant dense<0.000000e+00> : vector<16x128xf32>
      %20 = tpu.matmul %18, %19, %cst_17 {dimension_numbers = #tpu.dot_dimension_numbers<[1], [0], [0], [1], [0, 0, 1, 1], [], []>} : vector<16x128xf32>, vector<128x128xf32>, vector<16x128xf32> -> vector<16x128xf32>
      %c0_18 = arith.constant 0 : index
      %c0_19 = arith.constant 0 : index
      %21 = vector.load %arg6[%c0_18, %c0_19] : memref<128x128xf32, #tpu.memory_space<vmem>>, vector<128x128xf32>
      %cst_20 = arith.constant dense<0.000000e+00> : vector<16x128xf32>
      %22 = tpu.matmul %17, %21, %cst_20 {dimension_numbers = #tpu.dot_dimension_numbers<[1], [0], [0], [1], [0, 0, 1, 1], [], []>} : vector<16x128xf32>, vector<128x128xf32>, vector<16x128xf32> -> vector<16x128xf32>
      %23 = arith.addf %20, %22 : vector<16x128xf32>
      %c0_21 = arith.constant 0 : index
      %c0_22 = arith.constant 0 : index
      %24 = vector.load %arg7[%c0_21, %c0_22] : memref<1x128xf32, #tpu.memory_space<vmem>>, vector<1x128xf32>
      %25 = vector.broadcast %24 : vector<1x128xf32> to vector<16x128xf32>
      %26 = arith.addf %23, %25 : vector<16x128xf32>
      %c0_23 = arith.constant 0 : index
      %c0_24 = arith.constant 0 : index
      %27 = vector.load %arg8[%c0_23, %c0_24] : memref<16x128xf32, #tpu.memory_space<vmem>>, vector<16x128xf32>
      tpu.vector_store %arg8[%c0_23, %c0_24], %26 {strides = array<i32>} : memref<16x128xf32, #tpu.memory_space<vmem>>, vector<16x128xf32>,
    } else {
    }
    return
  }
  func.func @transform_0(%arg0: i32, %arg1: i32) -> (i32, i32) {
    %c0_i32 = arith.constant 0 : i32
    return %arg0, %arg1 : i32, i32
  }
  func.func @transform_1(%arg0: i32, %arg1: i32) -> (i32, i32) {
    %c0_i32 = arith.constant 0 : i32
    %c0_i32_0 = arith.constant 0 : i32
    return %arg1, %c0_i32 : i32, i32
  }
  func.func @transform_2(%arg0: i32, %arg1: i32) -> (i32, i32) {
    %c0_i32 = arith.constant 0 : i32
    %c0_i32_0 = arith.constant 0 : i32
    %c0_i32_1 = arith.constant 0 : i32
    return %c0_i32, %c0_i32_0 : i32, i32
  }
  func.func @transform_3(%arg0: i32, %arg1: i32) -> (i32, i32) {
    %c0_i32 = arith.constant 0 : i32
    %c0_i32_0 = arith.constant 0 : i32
    %c0_i32_1 = arith.constant 0 : i32
    return %c0_i32, %c0_i32_0 : i32, i32
  }
  func.func @transform_4(%arg0: i32, %arg1: i32) -> (i32, i32) {
    %c0_i32 = arith.constant 0 : i32
    %c0_i32_0 = arith.constant 0 : i32
    %c0_i32_1 = arith.constant 0 : i32
    return %c0_i32, %c0_i32_0 : i32, i32
  }
  func.func @transform_5(%arg0: i32, %arg1: i32) -> (i32, i32) {
    %c0_i32 = arith.constant 0 : i32
    %c0_i32_0 = arith.constant 0 : i32
    %c0_i32_1 = arith.constant 0 : i32
    return %c0_i32, %c0_i32_0 : i32, i32
  }
  func.func @transform_6(%arg0: i32, %arg1: i32) -> (i32, i32) {
    %c0_i32 = arith.constant 0 : i32
    %c0_i32_0 = arith.constant 0 : i32
    return %arg0, %c0_i32 : i32, i32
  }
}

</mosaic_0001>

<bundles_post_ra>
// kernel: tpu_custom_call.1
= control target key start
LH: loop header
LB: loop body
LE: loop exit
PB: predicated region body
PF: predicated region fallthrough
CT: control target
= control target key end

     0   :  { %11 = vsyncpa [#allocation4], 0  ;;  %s1219_s0 = inlined_call_operand.hbm [shape: f32[16,1024], index: 0, kind: input, shape index: {}]   ;;  %s1220_s1 = inlined_call_operand.hbm [shape: f32[1024,128], index: 1, kind: input, shape index: {}]   ;;  %s1221_s2 = inlined_call_operand.vmem [shape: f32[1,128], index: 2, kind: input, shape index: {}]   ;;  %s1222_s3 = inlined_call_operand.hbm [shape: f32[128,128], index: 3, kind: input, shape index: {}]   ;;  %s1223_s4 = inlined_call_operand.hbm [shape: f32[128,128], index: 4, kind: input, shape index: {}]   ;;  %s1224_s5 = inlined_call_operand.vmem [shape: f32[1,128], index: 5, kind: input, shape index: {}]   ;;  %s1225_s6 = inlined_call_operand.hbm [shape: f32[16,128], index: 6, kind: output, shape index: {}]  }
   0x1   :  { %12 = vsyncpa [#allocation7], 0 }
   0x2   :  { %13 = vsyncpa [#allocation10], 0 }
   0x3   :  { %14 = vsyncpa [#allocation5], 0  ;;  %s1142_s21 = smov [#allocation6]  }
   0x4   :  { %s32_s22 = sshll.u32 %s1142_s21, 4  ;;  %s33_s22 = int_to_ptr.vmem [resolvable:$true] %s32_s22 }
   0x5   :  { %s1042_s23 = scalar_lea.vmem %s33_s22, 16384  ;;  %p1047_p1 = scmp.lt.s32.totalorder %s33_s22, %s33_s22 }
   0x6   :  { %p1043_p0 = scmp.ne.s32.totalorder %s33_s22, %s1042_s23  ;;  %p1048_p2 = scmp.lt.s32.totalorder %s1042_s23, %s1042_s23 }
   0x8   :  { %p1049_p3 = por %p1048_p2, %p1047_p1 }
   0xa   :  { %p1050_p4 = pnand %p1049_p3, %p1043_p0 }
   0xc   :  { %1053 = shalt.err (!%p1050_p4)
}
   0xd   :  { %s1143_s24 = smov 128   ;;  %s1144_s25 = smov 8  }
   0xe   :  { %38 = dma.hbm_to_vmem [thread:$0]  %s1220_s1, 16384, %s33_s22, [#allocation7], %s1143_s24, %s1143_s24, %s1144_s25  }
   0xf   :  { %s1145_s28 = smov [#allocation3]  }
  0x10   :  { %s20_s29 = sshll.u32 %s1145_s28, 4  ;;  %s21_s29 = int_to_ptr.vmem [resolvable:$true] %s20_s29 }
  0x11   :  { %s1062_s30 = scalar_lea.vmem %s21_s29, 2048  ;;  %p1067_p6 = scmp.lt.s32.totalorder %s21_s29, %s21_s29 }
  0x12   :  { %p1063_p5 = scmp.ne.s32.totalorder %s21_s29, %s1062_s30  ;;  %p1068_p7 = scmp.lt.s32.totalorder %s1062_s30, %s1062_s30 }
  0x14   :  { %p1069_p8 = por %p1068_p7, %p1067_p6 }
  0x16   :  { %p1070_p9 = pnand %p1069_p8, %p1063_p5 }
  0x18   :  { %1073 = shalt.err (!%p1070_p9)
}
  0x19   :  { %s1146_s7 = smov 1024   ;;  %s1147_s8 = smov 64  }
  0x1a   :  { %26 = dma.hbm_to_vmem [thread:$0]  %s1219_s0, 2048, %s21_s29, [#allocation4], %s1146_s7, %s1146_s7, %s1147_s8  }
  0x1b   :  { %s1148_s11 = smov [#allocation8]   ;;  %s1149_s13 = smov [#allocation9]  }
  0x1c   :  { %s46_s12 = sshll.u32 %s1148_s11, 4  ;;  %s58_s1 = sshll.u32 %s1149_s13, 4  ;;  %s47_s12 = int_to_ptr.vmem [resolvable:$true] %s46_s12  ;;  %s59_s1 = int_to_ptr.vmem [resolvable:$true] %s58_s1 }
  0x1d   :  { %s1082_s14 = scalar_lea.vmem %s47_s12, 2048  ;;  %p1087_p11 = scmp.lt.s32.totalorder %s47_s12, %s47_s12 }
  0x1e   :  { %p1083_p10 = scmp.ne.s32.totalorder %s47_s12, %s1082_s14  ;;  %p1088_p12 = scmp.lt.s32.totalorder %s1082_s14, %s1082_s14 }
  0x20   :  { %p1089_p13 = por %p1088_p12, %p1087_p11 }
  0x22   :  { %p1090_p0 = pnand %p1089_p13, %p1083_p10 }
  0x24   :  { %1093 = shalt.err (!%p1090_p0)
}
  0x25   :  { %52 = dma.hbm_to_vmem [thread:$0]  %s1222_s3, 2048, %s47_s12, [#allocation7], %s1143_s24, %s1143_s24, %s1144_s25  }
  0x26   :  { %s1102_s0 = scalar_lea.vmem %s59_s1, 2048  ;;  %p1107_p2 = scmp.lt.s32.totalorder %s59_s1, %s59_s1 }
  0x27   :  { %p1103_p1 = scmp.ne.s32.totalorder %s59_s1, %s1102_s0  ;;  %p1108_p3 = scmp.lt.s32.totalorder %s1102_s0, %s1102_s0 }
  0x29   :  { %p1109_p4 = por %p1108_p3, %p1107_p2 }
  0x2b   :  { %p1110_p5 = pnand %p1109_p4, %p1103_p1 }
  0x2d   :  { %1113 = shalt.err (!%p1110_p5)
}
  0x2e   :  { %64 = dma.hbm_to_vmem [thread:$0]  %s1223_s4, 2048, %s59_s1, [#allocation10], %s1143_s24, %s1143_s24, %s1144_s25  }
  0x2f   :  { %1134 = dma.done.wait [#allocation4], 2048  }
  0x30   :  { %1135 = vsyncadd [#allocation4], 4294965248 }
  0x31   :  { %1136 = dma.done.wait [#allocation7], 18432  }
  0x32   :  { %1137 = vsyncadd [#allocation7], 4294948864 }
  0x33   :  { %1138 = dma.done.wait [#allocation10], 2048  }
  0x34   :  { %1139 = vsyncadd [#allocation10], 4294965248  ;;  %v134_v0 = vld [vmem:[#allocation6 + $0xf8] sm:$0xff]  ;;  %v133_v4 = vld [vmem:[#allocation6 + $0xf0] sm:$0xff]  ;;  %s1150_s20 = smov [#allocation11]  }
  0x35   :  { %v166_v1 = vld [vmem:[#allocation6 + $0x1f8] sm:$0xff]  ;;  %767 = vmatprep.subr.mxu0 %v134_v0  ;;  %v165_v5 = vld [vmem:[#allocation6 + $0x1f0] sm:$0xff]  ;;  %v132_v8 = vld [vmem:[#allocation6 + $0xe8] sm:$0xff]  ;;  %s751_s21 = sshll.u32 %s1150_s20, 4  ;;  %s752_s21 = int_to_ptr.vmem [resolvable:$true] %s751_s21 }
  0x36   :  { %v118_v2 = vld [vmem:[#allocation6 + $0x78] sm:$0xff]  ;;  %805 = vmatprep.subr.mxu1 %v166_v1  ;;  %v117_v6 = vld [vmem:[#allocation6 + $0x70] sm:$0xff]  ;;  %v164_v9 = vld [vmem:[#allocation6 + $0x1e8] sm:$0xff]  ;;  %s1114_s22 = scalar_lea.vmem %s752_s21, 256  ;;  %p1119_p7 = scmp.lt.s32.totalorder %s752_s21, %s752_s21 }
  0x37   :  { %v150_v3 = vld [vmem:[#allocation6 + $0x178] sm:$0xff]  ;;  %768 = vmatpush3.msra.mxu0 %v118_v2  ;;  %v149_v7 = vld [vmem:[#allocation6 + $0x170] sm:$0xff]  ;;  %v116_v10 = vld [vmem:[#allocation6 + $0x68] sm:$0xff]  ;;  %p1115_p6 = scmp.ne.s32.totalorder %s752_s21, %s1114_s22  ;;  %p1120_p8 = scmp.lt.s32.totalorder %s1114_s22, %s1114_s22 }
  0x38   :  { %806 = vmatpush3.msra.mxu1 %v150_v3  ;;  %769 = vmatprep.subr.mxu0 %v133_v4  ;;  %v148_v11 = vld [vmem:[#allocation6 + $0x168] sm:$0xff]  ;;  %v131_v12 = vld [vmem:[#allocation6 + $0xe0] sm:$0xff]  ;;  %v130_v16 = vld [vmem:[#allocation6 + $0xd8] sm:$0xff] }
  0x39   :  { %807 = vmatprep.subr.mxu1 %v165_v5  ;;  %770 = vmatpush3.msra.mxu0 %v117_v6  ;;  %v163_v13 = vld [vmem:[#allocation6 + $0x1e0] sm:$0xff]  ;;  %v162_v17 = vld [vmem:[#allocation6 + $0x1d8] sm:$0xff]  ;;  %v129_v20 = vld [vmem:[#allocation6 + $0xd0] sm:$0xff]  ;;  %p1121_p9 = por %p1120_p8, %p1119_p7 }
  0x3a   :  { %808 = vmatpush3.msra.mxu1 %v149_v7  ;;  %771 = vmatprep.subr.mxu0 %v132_v8  ;;  %v115_v14 = vld [vmem:[#allocation6 + $0x60] sm:$0xff]  ;;  %v114_v18 = vld [vmem:[#allocation6 + $0x58] sm:$0xff]  ;;  %v161_v21 = vld [vmem:[#allocation6 + $0x1d0] sm:$0xff] }
  0x3b   :  { %809 = vmatprep.subr.mxu1 %v164_v9  ;;  %v147_v15 = vld [vmem:[#allocation6 + $0x160] sm:$0xff]  ;;  %772 = vmatpush3.msra.mxu0 %v116_v10  ;;  %v146_v19 = vld [vmem:[#allocation6 + $0x158] sm:$0xff]  ;;  %v113_v22 = vld [vmem:[#allocation6 + $0x50] sm:$0xff]  ;;  %p1122_p10 = pnand %p1121_p9, %p1115_p6 }
  0x3c   :  { %810 = vmatpush3.msra.mxu1 %v148_v11  ;;  %773 = vmatprep.subr.mxu0 %v131_v12  ;;  %v145_v23 = vld [vmem:[#allocation6 + $0x150] sm:$0xff]  ;;  %v128_v24 = vld [vmem:[#allocation6 + $0xc8] sm:$0xff]  ;;  %v127_v28 = vld [vmem:[#allocation6 + $0xc0] sm:$0xff] }
  0x3d   :  { %811 = vmatprep.subr.mxu1 %v163_v13  ;;  %774 = vmatpush3.msra.mxu0 %v115_v14  ;;  %v160_v25 = vld [vmem:[#allocation6 + $0x1c8] sm:$0xff]  ;;  %v159_v29 = vld [vmem:[#allocation6 + $0x1c0] sm:$0xff]  ;;  %v126_v32 = vld [vmem:[#allocation6 + $0xb8] sm:$0xff] }
  0x3e   :  { %812 = vmatpush3.msra.mxu1 %v147_v15  ;;  %775 = vmatprep.subr.mxu0 %v130_v16  ;;  %v112_v26 = vld [vmem:[#allocation6 + $0x48] sm:$0xff]  ;;  %v111_v30 = vld [vmem:[#allocation6 + $0x40] sm:$0xff]  ;;  %v158_v33 = vld [vmem:[#allocation6 + $0x1b8] sm:$0xff] }
  0x3f   :  { %813 = vmatprep.subr.mxu1 %v162_v17  ;;  %776 = vmatpush3.msra.mxu0 %v114_v18  ;;  %v144_v27 = vld [vmem:[#allocation6 + $0x148] sm:$0xff]  ;;  %v143_v31 = vld [vmem:[#allocation6 + $0x140] sm:$0xff]  ;;  %v110_v34 = vld [vmem:[#allocation6 + $0x38] sm:$0xff] }
  0x40   :  { %814 = vmatpush3.msra.mxu1 %v146_v19  ;;  %777 = vmatprep.subr.mxu0 %v129_v20  ;;  %v142_v35 = vld [vmem:[#allocation6 + $0x138] sm:$0xff]  ;;  %v125_v36 = vld [vmem:[#allocation6 + $0xb0] sm:$0xff]  ;;  %v124_v40 = vld [vmem:[#allocation6 + $0xa8] sm:$0xff] }
  0x41   :  { %815 = vmatprep.subr.mxu1 %v161_v21  ;;  %778 = vmatpush3.msra.mxu0 %v113_v22  ;;  %v157_v37 = vld [vmem:[#allocation6 + $0x1b0] sm:$0xff]  ;;  %v156_v41 = vld [vmem:[#allocation6 + $0x1a8] sm:$0xff]  ;;  %v123_v44 = vld [vmem:[#allocation6 + $0xa0] sm:$0xff] }
  0x42   :  { %816 = vmatpush3.msra.mxu1 %v145_v23  ;;  %779 = vmatprep.subr.mxu0 %v128_v24  ;;  %v109_v38 = vld [vmem:[#allocation6 + $0x30] sm:$0xff]  ;;  %v108_v42 = vld [vmem:[#allocation6 + $0x28] sm:$0xff]  ;;  %v155_v45 = vld [vmem:[#allocation6 + $0x1a0] sm:$0xff] }
  0x43   :  { %817 = vmatprep.subr.mxu1 %v160_v25  ;;  %780 = vmatpush3.msra.mxu0 %v112_v26  ;;  %v141_v39 = vld [vmem:[#allocation6 + $0x130] sm:$0xff]  ;;  %v140_v43 = vld [vmem:[#allocation6 + $0x128] sm:$0xff]  ;;  %v107_v46 = vld [vmem:[#allocation6 + $0x20] sm:$0xff] }
  0x44   :  { %818 = vmatpush3.msra.mxu1 %v144_v27  ;;  %781 = vmatprep.subr.mxu0 %v127_v28  ;;  %v139_v47 = vld [vmem:[#allocation6 + $0x120] sm:$0xff]  ;;  %v122_v48 = vld [vmem:[#allocation6 + $0x98] sm:$0xff]  ;;  %v121_v52 = vld [vmem:[#allocation6 + $0x90] sm:$0xff] }
  0x45   :  { %819 = vmatprep.subr.mxu1 %v159_v29  ;;  %782 = vmatpush3.msra.mxu0 %v111_v30  ;;  %v154_v49 = vld [vmem:[#allocation6 + $0x198] sm:$0xff]  ;;  %v153_v53 = vld [vmem:[#allocation6 + $0x190] sm:$0xff]  ;;  %v120_v56 = vld [vmem:[#allocation6 + $0x88] sm:$0xff] }
  0x46   :  { %820 = vmatpush3.msra.mxu1 %v143_v31  ;;  %783 = vmatprep.subr.mxu0 %v126_v32  ;;  %v106_v50 = vld [vmem:[#allocation6 + $0x18] sm:$0xff]  ;;  %v105_v54 = vld [vmem:[#allocation6 + $0x10] sm:$0xff]  ;;  %v152_v57 = vld [vmem:[#allocation6 + $0x188] sm:$0xff] }
  0x47   :  { %821 = vmatprep.subr.mxu1 %v158_v33  ;;  %784 = vmatpush3.msra.mxu0 %v110_v34  ;;  %v138_v51 = vld [vmem:[#allocation6 + $0x118] sm:$0xff]  ;;  %v137_v55 = vld [vmem:[#allocation6 + $0x110] sm:$0xff]  ;;  %v104_v58 = vld [vmem:[#allocation6 + $0x8] sm:$0xff] }
  0x48   :  { %822 = vmatpush3.msra.mxu1 %v142_v35  ;;  %785 = vmatprep.subr.mxu0 %v125_v36  ;;  %v136_v59 = vld [vmem:[#allocation6 + $0x108] sm:$0xff]  ;;  %v119_v60 = vld [vmem:[#allocation6 + $0x80] sm:$0xff]  ;;  %v90_v1 = vld [vmem:[#allocation3 + $0x18] sm:$0xff] }
  0x49   :  { %823 = vmatprep.subr.mxu1 %v157_v37  ;;  %786 = vmatpush3.msra.mxu0 %v109_v38  ;;  %v151_v61 = vld [vmem:[#allocation6 + $0x180] sm:$0xff]  ;;  %v88_v63 = vld [vmem:[#allocation3 + $0x8] sm:$0xff]  ;;  %v89_v3 = vld [vmem:[#allocation3 + $0x10] sm:$0xff] }
  0x4a   :  { %824 = vmatpush3.msra.mxu1 %v141_v39  ;;  %787 = vmatprep.subr.mxu0 %v124_v40  ;;  %v103_v62 = vld [vmem:[#allocation6] sm:$0xff]  ;;  %v198_v4 = vld [vmem:[#allocation6 + $0x2f8] sm:$0xff]  ;;  %v197_v8 = vld [vmem:[#allocation6 + $0x2f0] sm:$0xff] }
  0x4b   :  { %825 = vmatprep.subr.mxu1 %v156_v41  ;;  %788 = vmatpush3.msra.mxu0 %v108_v42  ;;  %v135_v0 = vld [vmem:[#allocation6 + $0x100] sm:$0xff]  ;;  %v230_v5 = vld [vmem:[#allocation6 + $0x3f8] sm:$0xff]  ;;  %v229_v9 = vld [vmem:[#allocation6 + $0x3f0] sm:$0xff] }
  0x4c   :  { %826 = vmatpush3.msra.mxu1 %v140_v43  ;;  %789 = vmatprep.subr.mxu0 %v123_v44  ;;  %v87_v2 = vld [vmem:[#allocation3] sm:$0xff]  ;;  %v182_v6 = vld [vmem:[#allocation6 + $0x278] sm:$0xff]  ;;  %v181_v10 = vld [vmem:[#allocation6 + $0x270] sm:$0xff] }
  0x4d   :  { %827 = vmatprep.subr.mxu1 %v155_v45  ;;  %790 = vmatpush3.msra.mxu0 %v107_v46  ;;  %v214_v7 = vld [vmem:[#allocation6 + $0x378] sm:$0xff]  ;;  %v213_v11 = vld [vmem:[#allocation6 + $0x370] sm:$0xff]  ;;  %v196_v12 = vld [vmem:[#allocation6 + $0x2e8] sm:$0xff] }
  0x4e   :  { %828 = vmatpush3.msra.mxu1 %v139_v47  ;;  %791 = vmatprep.subr.mxu0 %v122_v48  ;;  %v228_v13 = vld [vmem:[#allocation6 + $0x3e8] sm:$0xff]  ;;  %v195_v16 = vld [vmem:[#allocation6 + $0x2e0] sm:$0xff]  ;;  %v194_v20 = vld [vmem:[#allocation6 + $0x2d8] sm:$0xff] }
  0x4f   :  { %829 = vmatprep.subr.mxu1 %v154_v49  ;;  %792 = vmatpush3.msra.mxu0 %v106_v50  ;;  %v180_v14 = vld [vmem:[#allocation6 + $0x268] sm:$0xff]  ;;  %v227_v17 = vld [vmem:[#allocation6 + $0x3e0] sm:$0xff]  ;;  %v226_v21 = vld [vmem:[#allocation6 + $0x3d8] sm:$0xff] }
  0x50   :  { %830 = vmatpush3.msra.mxu1 %v138_v51  ;;  %793 = vmatprep.subr.mxu0 %v121_v52  ;;  %v212_v15 = vld [vmem:[#allocation6 + $0x368] sm:$0xff]  ;;  %v179_v18 = vld [vmem:[#allocation6 + $0x260] sm:$0xff]  ;;  %v178_v22 = vld [vmem:[#allocation6 + $0x258] sm:$0xff] }
  0x51   :  { %831 = vmatprep.subr.mxu1 %v153_v53  ;;  %794 = vmatpush3.msra.mxu0 %v105_v54  ;;  %v211_v19 = vld [vmem:[#allocation6 + $0x360] sm:$0xff]  ;;  %v210_v23 = vld [vmem:[#allocation6 + $0x358] sm:$0xff]  ;;  %v193_v24 = vld [vmem:[#allocation6 + $0x2d0] sm:$0xff] }
  0x52   :  { %832 = vmatpush3.msra.mxu1 %v137_v55  ;;  %795 = vmatprep.subr.mxu0 %v120_v56  ;;  %v225_v25 = vld [vmem:[#allocation6 + $0x3d0] sm:$0xff]  ;;  %v192_v28 = vld [vmem:[#allocation6 + $0x2c8] sm:$0xff]  ;;  %v191_v32 = vld [vmem:[#allocation6 + $0x2c0] sm:$0xff] }
  0x53   :  { %833 = vmatprep.subr.mxu1 %v152_v57  ;;  %796 = vmatpush3.msra.mxu0 %v104_v58  ;;  %v177_v26 = vld [vmem:[#allocation6 + $0x250] sm:$0xff]  ;;  %v224_v29 = vld [vmem:[#allocation6 + $0x3c8] sm:$0xff]  ;;  %v223_v33 = vld [vmem:[#allocation6 + $0x3c0] sm:$0xff] }
  0x54   :  { %834 = vmatpush3.msra.mxu1 %v136_v59  ;;  %797 = vmatprep.subr.mxu0 %v119_v60  ;;  %v209_v27 = vld [vmem:[#allocation6 + $0x350] sm:$0xff]  ;;  %v176_v30 = vld [vmem:[#allocation6 + $0x248] sm:$0xff]  ;;  %v175_v34 = vld [vmem:[#allocation6 + $0x240] sm:$0xff] }
  0x55   :  { %835 = vmatprep.subr.mxu1 %v151_v61  ;;  %798 = vmatpush3.msra.mxu0 %v103_v62  ;;  %v208_v31 = vld [vmem:[#allocation6 + $0x348] sm:$0xff]  ;;  %v207_v35 = vld [vmem:[#allocation6 + $0x340] sm:$0xff]  ;;  %v190_v36 = vld [vmem:[#allocation6 + $0x2b8] sm:$0xff] }
  0x56   :  { %295 = vmatprep.mubr.f32.mxu0 %v88_v63  ;;  %836 = vmatpush3.msra.mxu1 %v135_v0  ;;  %v222_v37 = vld [vmem:[#allocation6 + $0x3b8] sm:$0xff]  ;;  %v189_v40 = vld [vmem:[#allocation6 + $0x2b0] sm:$0xff]  ;;  %v188_v44 = vld [vmem:[#allocation6 + $0x2a8] sm:$0xff] }
  0x57   :  { %370 = vmatprep.mubr.f32.mxu1 %v90_v1  ;;  %296 = vmatmul.mubr.f32.vlgmr.msra.gmra.mxu0 %v87_v2  ;;  %v174_v38 = vld [vmem:[#allocation6 + $0x238] sm:$0xff]  ;;  %v221_v41 = vld [vmem:[#allocation6 + $0x3b0] sm:$0xff]  ;;  %v220_v45 = vld [vmem:[#allocation6 + $0x3a8] sm:$0xff] }
  0x58   :  { %371 = vmatmul.mubr.f32.vlgmr.msra.gmra.mxu1 %v89_v3  ;;  %843 = vmatprep.subr.mxu0 %v198_v4  ;;  %v206_v39 = vld [vmem:[#allocation6 + $0x338] sm:$0xff]  ;;  %v173_v42 = vld [vmem:[#allocation6 + $0x230] sm:$0xff]  ;;  %v172_v46 = vld [vmem:[#allocation6 + $0x228] sm:$0xff] }
  0x59   :  { %881 = vmatprep.subr.mxu1 %v230_v5  ;;  %844 = vmatpush3.msra.mxu0 %v182_v6  ;;  %v205_v43 = vld [vmem:[#allocation6 + $0x330] sm:$0xff]  ;;  %v204_v47 = vld [vmem:[#allocation6 + $0x328] sm:$0xff]  ;;  %v187_v48 = vld [vmem:[#allocation6 + $0x2a0] sm:$0xff] }
  0x5a   :  { %882 = vmatpush3.msra.mxu1 %v214_v7  ;;  %845 = vmatprep.subr.mxu0 %v197_v8  ;;  %v219_v49 = vld [vmem:[#allocation6 + $0x3a0] sm:$0xff]  ;;  %v186_v52 = vld [vmem:[#allocation6 + $0x298] sm:$0xff]  ;;  %v96_v54 = vld [vmem:[#allocation3 + $0x48] sm:$0xff] }
  0x5b   :  { %883 = vmatprep.subr.mxu1 %v229_v9  ;;  %846 = vmatpush3.msra.mxu0 %v181_v10  ;;  %v171_v50 = vld [vmem:[#allocation6 + $0x220] sm:$0xff]  ;;  %v218_v53 = vld [vmem:[#allocation6 + $0x398] sm:$0xff]  ;;  %v97_v59 = vld [vmem:[#allocation3 + $0x50] sm:$0xff] }
  0x5c   :  { %884 = vmatpush3.msra.mxu1 %v213_v11  ;;  %847 = vmatprep.subr.mxu0 %v196_v12  ;;  %v203_v51 = vld [vmem:[#allocation6 + $0x320] sm:$0xff]  ;;  %v98_v55 = vld [vmem:[#allocation3 + $0x58] sm:$0xff]  ;;  %v185_v60 = vld [vmem:[#allocation6 + $0x290] sm:$0xff] }
  0x5d   :  { %885 = vmatprep.subr.mxu1 %v228_v13  ;;  %848 = vmatpush3.msra.mxu0 %v180_v14  ;;  %v170_v56 = vld [vmem:[#allocation6 + $0x218] sm:$0xff]  ;;  %v95_v58 = vld [vmem:[#allocation3 + $0x40] sm:$0xff]  ;;  %v217_v61 = vld [vmem:[#allocation6 + $0x390] sm:$0xff] }
  0x5e   :  { %886 = vmatpush3.msra.mxu1 %v212_v15  ;;  %849 = vmatprep.subr.mxu0 %v195_v16  ;;  %v202_v57 = vld [vmem:[#allocation6 + $0x318] sm:$0xff]  ;;  %v169_v62 = vld [vmem:[#allocation6 + $0x210] sm:$0xff]  ;;  %v184_v0 = vld [vmem:[#allocation6 + $0x288] sm:$0xff] }
  0x5f   :  { %887 = vmatprep.subr.mxu1 %v227_v17  ;;  %850 = vmatpush3.msra.mxu0 %v179_v18  ;;  %v201_v63 = vld [vmem:[#allocation6 + $0x310] sm:$0xff]  ;;  %v216_v1 = vld [vmem:[#allocation6 + $0x388] sm:$0xff]  ;;  %v183_v4 = vld [vmem:[#allocation6 + $0x280] sm:$0xff] }
  0x60   :  { %888 = vmatpush3.msra.mxu1 %v211_v19  ;;  %851 = vmatprep.subr.mxu0 %v194_v20  ;;  %v168_v2 = vld [vmem:[#allocation6 + $0x208] sm:$0xff]  ;;  %v215_v5 = vld [vmem:[#allocation6 + $0x380] sm:$0xff]  ;;  %v94_v9 = vld [vmem:[#allocation3 + $0x38] sm:$0xff] }
  0x61   :  { %889 = vmatprep.subr.mxu1 %v226_v21  ;;  %852 = vmatpush3.msra.mxu0 %v178_v22  ;;  %v200_v3 = vld [vmem:[#allocation6 + $0x308] sm:$0xff]  ;;  %v167_v6 = vld [vmem:[#allocation6 + $0x200] sm:$0xff]  ;;  %v93_v11 = vld [vmem:[#allocation3 + $0x30] sm:$0xff] }
  0x62   :  { %890 = vmatpush3.msra.mxu1 %v210_v23  ;;  %853 = vmatprep.subr.mxu0 %v193_v24  ;;  %v92_v7 = vld [vmem:[#allocation3 + $0x28] sm:$0xff]  ;;  %v199_v8 = vld [vmem:[#allocation6 + $0x300] sm:$0xff]  ;;  %v102_v13 = vld [vmem:[#allocation3 + $0x78] sm:$0xff] }
  0x63   :  { %891 = vmatprep.subr.mxu1 %v225_v25  ;;  %854 = vmatpush3.msra.mxu0 %v177_v26  ;;  %v91_v10 = vld [vmem:[#allocation3 + $0x20] sm:$0xff]  ;;  %v100_v12 = vld [vmem:[#allocation3 + $0x68] sm:$0xff]  ;;  %v101_v15 = vld [vmem:[#allocation3 + $0x70] sm:$0xff] }
  0x64   :  { %892 = vmatpush3.msra.mxu1 %v209_v27  ;;  %855 = vmatprep.subr.mxu0 %v192_v28  ;;  %v99_v14 = vld [vmem:[#allocation3 + $0x60] sm:$0xff]  ;;  %v584_v16 = vld [vmem:[#allocation9 + $0x78] sm:$0xff]  ;;  %v583_v17 = vld [vmem:[#allocation9 + $0x70] sm:$0xff] }
  0x65   :  { %893 = vmatprep.subr.mxu1 %v224_v29  ;;  %856 = vmatpush3.msra.mxu0 %v176_v30  ;;  %v568_v18 = vld [vmem:[#allocation8 + $0x78] sm:$0xff]  ;;  %v567_v19 = vld [vmem:[#allocation8 + $0x70] sm:$0xff]  ;;  %v582_v20 = vld [vmem:[#allocation9 + $0x68] sm:$0xff] }
  0x66   :  { %894 = vmatpush3.msra.mxu1 %v208_v31  ;;  %857 = vmatprep.subr.mxu0 %v191_v32  ;;  %v566_v21 = vld [vmem:[#allocation8 + $0x68] sm:$0xff]  ;;  %v581_v22 = vld [vmem:[#allocation9 + $0x60] sm:$0xff]  ;;  %v580_v24 = vld [vmem:[#allocation9 + $0x58] sm:$0xff] }
  0x67   :  { %895 = vmatprep.subr.mxu1 %v223_v33  ;;  %858 = vmatpush3.msra.mxu0 %v175_v34  ;;  %v565_v23 = vld [vmem:[#allocation8 + $0x60] sm:$0xff]  ;;  %v579_v25 = vld [vmem:[#allocation9 + $0x50] sm:$0xff]  ;;  %v564_v26 = vld [vmem:[#allocation8 + $0x58] sm:$0xff] }
  0x68   :  { %896 = vmatpush3.msra.mxu1 %v207_v35  ;;  %859 = vmatprep.subr.mxu0 %v190_v36  ;;  %v578_v27 = vld [vmem:[#allocation9 + $0x48] sm:$0xff]  ;;  %v563_v28 = vld [vmem:[#allocation8 + $0x50] sm:$0xff]  ;;  %v577_v29 = vld [vmem:[#allocation9 + $0x40] sm:$0xff] }
  0x69   :  { %897 = vmatprep.subr.mxu1 %v222_v37  ;;  %860 = vmatpush3.msra.mxu0 %v174_v38  ;;  %v562_v30 = vld [vmem:[#allocation8 + $0x48] sm:$0xff]  ;;  %v576_v31 = vld [vmem:[#allocation9 + $0x38] sm:$0xff]  ;;  %v561_v32 = vld [vmem:[#allocation8 + $0x40] sm:$0xff] }
  0x6a   :  { %898 = vmatpush3.msra.mxu1 %v206_v39  ;;  %861 = vmatprep.subr.mxu0 %v189_v40  ;;  %v575_v33 = vld [vmem:[#allocation9 + $0x30] sm:$0xff]  ;;  %v560_v34 = vld [vmem:[#allocation8 + $0x38] sm:$0xff]  ;;  %v574_v35 = vld [vmem:[#allocation9 + $0x28] sm:$0xff] }
  0x6b   :  { %899 = vmatprep.subr.mxu1 %v221_v41  ;;  %862 = vmatpush3.msra.mxu0 %v173_v42  ;;  %v559_v36 = vld [vmem:[#allocation8 + $0x30] sm:$0xff]  ;;  %v573_v37 = vld [vmem:[#allocation9 + $0x20] sm:$0xff]  ;;  %v558_v38 = vld [vmem:[#allocation8 + $0x28] sm:$0xff] }
  0x6c   :  { %900 = vmatpush3.msra.mxu1 %v205_v43  ;;  %863 = vmatprep.subr.mxu0 %v188_v44  ;;  %v572_v39 = vld [vmem:[#allocation9 + $0x18] sm:$0xff]  ;;  %v557_v40 = vld [vmem:[#allocation8 + $0x20] sm:$0xff]  ;;  %v571_v41 = vld [vmem:[#allocation9 + $0x10] sm:$0xff] }
  0x6d   :  { %901 = vmatprep.subr.mxu1 %v220_v45  ;;  %864 = vmatpush3.msra.mxu0 %v172_v46  ;;  %v556_v42 = vld [vmem:[#allocation8 + $0x18] sm:$0xff]  ;;  %v570_v43 = vld [vmem:[#allocation9 + $0x8] sm:$0xff]  ;;  %v555_v44 = vld [vmem:[#allocation8 + $0x10] sm:$0xff] }
  0x6e   :  { %902 = vmatpush3.msra.mxu1 %v204_v47  ;;  %865 = vmatprep.subr.mxu0 %v187_v48  ;;  %v569_v45 = vld [vmem:[#allocation9] sm:$0xff]  ;;  %v554_v46 = vld [vmem:[#allocation8 + $0x8] sm:$0xff] }
  0x6f   :  { %903 = vmatprep.subr.mxu1 %v219_v49  ;;  %866 = vmatpush3.msra.mxu0 %v171_v50  ;;  %v553_v47 = vld [vmem:[#allocation8] sm:$0xff] }
  0x70   :  { %904 = vmatpush3.msra.mxu1 %v203_v51  ;;  %867 = vmatprep.subr.mxu0 %v186_v52 }
  0x71   :  { %905 = vmatprep.subr.mxu1 %v218_v53  ;;  %300 = vmatprep.mubr.f32.mxu0 %v96_v54 }
  0x72   :  { %375 = vmatprep.mubr.f32.mxu1 %v98_v55  ;;  %868 = vmatpush3.msra.mxu0 %v170_v56 }
  0x73   :  { %906 = vmatpush3.msra.mxu1 %v202_v57  ;;  %301 = vmatmul.mubr.f32.gmra.mxu0 %v95_v58 }
  0x74   :  { %376 = vmatmul.mubr.f32.gmra.mxu1 %v97_v59  ;;  %869 = vmatprep.subr.mxu0 %v185_v60 }
  0x75   :  { %907 = vmatprep.subr.mxu1 %v217_v61  ;;  %870 = vmatpush3.msra.mxu0 %v169_v62 }
  0x76   :  { %908 = vmatpush3.msra.mxu1 %v201_v63  ;;  %871 = vmatprep.subr.mxu0 %v184_v0 }
  0x77   :  { %909 = vmatprep.subr.mxu1 %v216_v1  ;;  %872 = vmatpush3.msra.mxu0 %v168_v2 }
  0x78   :  { %910 = vmatpush3.msra.mxu1 %v200_v3  ;;  %873 = vmatprep.subr.mxu0 %v183_v4 }
  0x79   :  { %911 = vmatprep.subr.mxu1 %v215_v5  ;;  %874 = vmatpush3.msra.mxu0 %v167_v6 }
  0x7a   :  { %445 = vmatprep.mubr.f32.mxu0 %v92_v7  ;;  %912 = vmatpush3.msra.mxu1 %v199_v8  ;;  %v765_v8 = vld [vmem:[%s1221_s2] ss:$0 sm:$0xff] }
  0x7b   :  { %520 = vmatprep.mubr.f32.mxu1 %v94_v9  ;;  %446 = vmatmul.mubr.f32.vlgmr.msra.gmra.mxu0 %v91_v10 }
  0x7c   :  { %521 = vmatmul.mubr.f32.vlgmr.msra.gmra.mxu1 %v93_v11  ;;  %450 = vmatprep.mubr.f32.mxu0 %v100_v12 }
  0x7d   :  { %525 = vmatprep.mubr.f32.mxu1 %v102_v13  ;;  %955 = vmatprep.subr.mxu0 %v584_v16 }
  0x7e   :  { %990 = vmatprep.subr.mxu1 %v568_v18  ;;  %956 = vmatpush3.msra.mxu0 %v584_v16 }
  0x7f   :  { %451 = vmatmul.mubr.f32.gmra.mxu0 %v99_v14  ;;  %991 = vmatpush3.msra.mxu1 %v568_v18 }
  0x80   :  { %526 = vmatmul.mubr.f32.gmra.mxu1 %v101_v15  ;;  %957 = vmatprep.subr.mxu0 %v583_v17 }
  0x81   :  { %992 = vmatprep.subr.mxu1 %v567_v19  ;;  %958 = vmatpush3.msra.mxu0 %v583_v17 }
  0x82   :  { %993 = vmatpush3.msra.mxu1 %v567_v19  ;;  %959 = vmatprep.subr.mxu0 %v582_v20 }
  0x83   :  { %994 = vmatprep.subr.mxu1 %v566_v21  ;;  %960 = vmatpush3.msra.mxu0 %v582_v20 }
  0x84   :  { %995 = vmatpush3.msra.mxu1 %v566_v21  ;;  %961 = vmatprep.subr.mxu0 %v581_v22 }
  0x85   :  { %996 = vmatprep.subr.mxu1 %v565_v23  ;;  %962 = vmatpush3.msra.mxu0 %v581_v22 }
  0x86   :  { %997 = vmatpush3.msra.mxu1 %v565_v23  ;;  %963 = vmatprep.subr.mxu0 %v580_v24  ;;  %v766_v23 = vld [vmem:[%s1224_s5] ss:$0 sm:$0xff] }
  0x87   :  { %964 = vmatpush3.msra.mxu0 %v580_v24  ;;  %998 = vmatprep.subr.mxu1 %v564_v26 }
  0x88   :  { %965 = vmatprep.subr.mxu0 %v579_v25  ;;  %999 = vmatpush3.msra.mxu1 %v564_v26 }
  0x89   :  { %966 = vmatpush3.msra.mxu0 %v579_v25  ;;  %1000 = vmatprep.subr.mxu1 %v563_v28 }
  0x8a   :  { %967 = vmatprep.subr.mxu0 %v578_v27  ;;  %1001 = vmatpush3.msra.mxu1 %v563_v28 }
  0x8b   :  { %968 = vmatpush3.msra.mxu0 %v578_v27  ;;  %1002 = vmatprep.subr.mxu1 %v562_v30 }
  0x8c   :  { %969 = vmatprep.subr.mxu0 %v577_v29  ;;  %1003 = vmatpush3.msra.mxu1 %v562_v30 }
  0x8d   :  { %970 = vmatpush3.msra.mxu0 %v577_v29  ;;  %1004 = vmatprep.subr.mxu1 %v561_v32 }
  0x8e   :  { %971 = vmatprep.subr.mxu0 %v576_v31  ;;  %1005 = vmatpush3.msra.mxu1 %v561_v32 }
  0x8f   :  { %972 = vmatpush3.msra.mxu0 %v576_v31  ;;  %1006 = vmatprep.subr.mxu1 %v560_v34 }
  0x90   :  { %973 = vmatprep.subr.mxu0 %v575_v33  ;;  %1007 = vmatpush3.msra.mxu1 %v560_v34 }
  0x91   :  { %974 = vmatpush3.msra.mxu0 %v575_v33  ;;  %1008 = vmatprep.subr.mxu1 %v559_v36 }
  0x92   :  { %975 = vmatprep.subr.mxu0 %v574_v35  ;;  %1009 = vmatpush3.msra.mxu1 %v559_v36 }
  0x93   :  { %976 = vmatpush3.msra.mxu0 %v574_v35  ;;  %1010 = vmatprep.subr.mxu1 %v558_v38 }
  0x94   :  { %977 = vmatprep.subr.mxu0 %v573_v37  ;;  %1011 = vmatpush3.msra.mxu1 %v558_v38 }
  0x95   :  { %978 = vmatpush3.msra.mxu0 %v573_v37  ;;  %1012 = vmatprep.subr.mxu1 %v557_v40 }
  0x96   :  { %979 = vmatprep.subr.mxu0 %v572_v39  ;;  %1013 = vmatpush3.msra.mxu1 %v557_v40 }
  0x97   :  { %980 = vmatpush3.msra.mxu0 %v572_v39  ;;  %1014 = vmatprep.subr.mxu1 %v556_v42 }
  0x98   :  { %981 = vmatprep.subr.mxu0 %v571_v41  ;;  %1015 = vmatpush3.msra.mxu1 %v556_v42 }
  0x99   :  { %982 = vmatpush3.msra.mxu0 %v571_v41  ;;  %1016 = vmatprep.subr.mxu1 %v555_v44 }
  0x9a   :  { %983 = vmatprep.subr.mxu0 %v570_v43  ;;  %1017 = vmatpush3.msra.mxu1 %v555_v44 }
  0x9b   :  { %984 = vmatpush3.msra.mxu0 %v570_v43  ;;  %1018 = vmatprep.subr.mxu1 %v554_v46 }
  0x9c   :  { %985 = vmatprep.subr.mxu0 %v569_v45  ;;  %1019 = vmatpush3.msra.mxu1 %v554_v46 }
  0x9d   :  { %986 = vmatpush3.msra.mxu0 %v569_v45  ;;  %1020 = vmatprep.subr.mxu1 %v553_v47 }
  0x9e   :  { %1021 = vmatpush3.msra.mxu1 %v553_v47 }
 0x117   :  { %v799_v48 = vpop.f32.mrf.mxu0 }
 0x118   :  { %v837_v49 = vpop.f32.mrf.mxu1 }
 0x119   :  { %v800_v50 = vpop.f32.mrf.mxu0 }
 0x11a   :  { %v838_v51 = vpop.f32.mrf.mxu1  ;;  %v801_v56 = vadd.f32 %v800_v50, %v799_v48 }
 0x11b   :  { %v839_v57 = vadd.f32 %v838_v51, %v837_v49 }
 0x11d   :  { %v373_v62 = vadd.f32 %v839_v57, %v801_v56 }
 0x133   :  { %v802_v52 = vpop.f32.mrf.mxu0 }
 0x134   :  { %v840_v53 = vpop.f32.mrf.mxu1 }
 0x135   :  { %v803_v54 = vpop.f32.mrf.mxu0 }
 0x136   :  { %v841_v55 = vpop.f32.mrf.mxu1  ;;  %v804_v63 = vadd.f32 %v803_v54, %v802_v52 }
 0x137   :  { %v842_v0 = vadd.f32 %v841_v55, %v840_v53 }
 0x139   :  { %v378_v9 = vadd.f32 %v842_v0, %v804_v63 }
 0x13b   :  { %v875_v58 = vpop.f32.mrf.mxu0 }
 0x13c   :  { %v913_v59 = vpop.f32.mrf.mxu1 }
 0x13d   :  { %v876_v60 = vpop.f32.mrf.mxu0 }
 0x13e   :  { %v914_v61 = vpop.f32.mrf.mxu1  ;;  %v877_v1 = vadd.f32 %v876_v60, %v875_v58 }
 0x13f   :  { %v878_v2 = vpop.f32.mrf.mxu0  ;;  %v915_v5 = vadd.f32 %v914_v61, %v913_v59 }
 0x140   :  { %v916_v3 = vpop.f32.mrf.mxu1  ;;  %v448_v4 = vadd.f32 %v877_v1, %v373_v62 }
 0x141   :  { %v879_v6 = vpop.f32.mrf.mxu0 }
 0x142   :  { %v917_v7 = vpop.f32.mrf.mxu1  ;;  %v523_v10 = vadd.f32 %v915_v5, %v448_v4  ;;  %v880_v11 = vadd.f32 %v879_v6, %v878_v2 }
 0x143   :  { %v918_v13 = vadd.f32 %v917_v7, %v916_v3 }
 0x144   :  { %v453_v12 = vadd.f32 %v880_v11, %v378_v9  ;;  %v547_v14 = vadd.f32 %v765_v8, %v523_v10 }
 0x146   :  { %v528_v15 = vadd.f32 %v918_v13, %v453_v12  ;;  %v549_v16 = vmax.f32 %v547_v14, 0.0 }
 0x148   :  { %v548_v17 = vadd.f32 %v765_v8, %v528_v15  ;;  %987 = vmatprep.mubr.f32.mxu0 %v549_v16  ;;  %v551_v18 = vmul.f32 %v549_v16, %v549_v16 }
 0x14a   :  { %v550_v19 = vmax.f32 %v548_v17, 0.0  ;;  %1022 = vmatprep.mubr.f32.mxu1 %v551_v18 }
 0x14c   :  { %v552_v20 = vmul.f32 %v550_v19, %v550_v19  ;;  %988 = vmatmul.mubr.f32.vlgmr.msra.gmra.mxu0 %v550_v19 }
 0x14e   :  { %1023 = vmatmul.mubr.f32.vlgmr.msra.gmra.mxu1 %v552_v20 }
 0x20c   :  { %v989_v21 = vpop.f32.mrf.mxu0 }
 0x20e   :  { %v1024_v22 = vpop.f32.mrf.mxu1  ;;  %v651_v25 = vpop.f32.mrf.mxu0 }
 0x20f   :  { %v732_v24 = vadd.f32 %v1024_v22, %v989_v21 }
 0x210   :  { %v726_v26 = vpop.f32.mrf.mxu1 }
 0x211   :  { %v743_v27 = vadd.f32 %v766_v23, %v732_v24  ;;  %v727_v28 = vadd.f32 %v726_v26, %v651_v25 }
 0x213   :  { %745 = vst [vmem:[#allocation11 + $0x8] sm:$0xff] %v743_v27  ;;  %v742_v29 = vadd.f32 %v766_v23, %v727_v28 }
 0x215   :  { %744 = vst [vmem:[#allocation11] sm:$0xff] %v742_v29 }
 0x216   :  { %1125 = shalt.err (!%p1122_p10)
}
 0x217   :  { %757 = dma.vmem_to_hbm [thread:$0]  %s752_s21, 256, %s1225_s6, [#allocation5], %s1143_s24, %s1143_s24, %s1144_s25  }
 0x218   :  { %1140 = dma.done.wait [#allocation5], 256  }
 0x219   :  { %1141 = vsyncadd [#allocation5], 4294967040 }
 0x21a   :  { %761 = vsyncpa [#allocation4], 1 }
 0x21b   :  { %762 = vsyncpa [#allocation7], 1 }
 0x21c   :  { %763 = vsyncpa [#allocation10], 1 }
 0x21d   :  { %764 = vsyncpa [#allocation5], 1 }

</bundles_post_ra>
